<compile_context>
chip_gen: v5e
topology: v5e:2x2
jax: 0.10.0
libtpu: 0.0.40
codegen_flags: <defaults>
</compile_context>

<pallas_src>
import math
import functools

import jax
import jax.numpy as jnp
from jax import lax
from jax.experimental import pallas as pl
from jax.experimental.pallas import tpu as pltpu


def _round_up(a, b):
    return ((a + b - 1) // b) * b


def _pick_tile(dim, target):
    """Largest tile <= target that is either the full dim or a 128-multiple divisor."""
    if dim <= target:
        return dim
    for cand in range(target, 127, -128):
        if dim % cand == 0:
            return cand
    return dim  # fallback: no tiling for large, non-128-aligned dims (rare)


def _lora_kernel(x_ref, w_ref, b_ref, a_ref, wb_ref, o_ref, acc_ref, lo_ref,
                 *, scaling):
    # Tiles seen by the kernel:
    #   x_ref  : (tm, tk)  input rows                    (varies with i, k)
    #   w_ref  : (tn, tk)  pretrained weight [out, in]   (varies with j, k)
    #   b_ref  : (1,  tn)  pretrained bias               (varies with j)
    #   a_ref  : (r,  tk)  lora_A weight [r, in]         (varies with k)
    #   wb_ref : (tn, r )  lora_B weight [out, r]        (varies with j)
    #   o_ref  : (tm, tn)  output tile                   (varies with i, j)
    #   acc_ref: (tm, tn)  f32 accumulator (persists over the K axis)
    #   lo_ref : (tm, r )  f32 LoRA-A activation (persists over J and K per row tile)
    j = pl.program_id(1)
    k = pl.program_id(2)
    nk = pl.num_programs(2)

    @pl.when(k == 0)
    def _():
        acc_ref[...] = jnp.zeros_like(acc_ref)

    @pl.when(jnp.logical_and(j == 0, k == 0))
    def _():
        lo_ref[...] = jnp.zeros_like(lo_ref)

    x = x_ref[...]

    # Frozen path: x[tm,tk] contracted with W[tn,tk] on the in_dim axis.
    acc_ref[...] += lax.dot_general(
        x, w_ref[...],
        dimension_numbers=(((1,), (1,)), ((), ())),
        preferred_element_type=jnp.float32)

    # LoRA-A path: independent of the output tile j, so compute once per row
    # tile (at j == 0) and reuse for every other j.
    # TODO(synk): lora_dropout is identity here (eval mode); training-mode dropout
    # would apply pltpu.prng_seed + pltpu.stateful_bernoulli to x before this dot.
    @pl.when(j == 0)
    def _():
        lo_ref[...] += lax.dot_general(
            x, a_ref[...],
            dimension_numbers=(((1,), (1,)), ((), ())),
            preferred_element_type=jnp.float32)

    @pl.when(k == nk - 1)
    def _():
        # Scale the tiny (tm, r) intermediate instead of the wide (tm, tn) result.
        lo_scaled = (lo_ref[...] * scaling).astype(wb_ref.dtype)
        lora = lax.dot_general(
            lo_scaled, wb_ref[...],
            dimension_numbers=(((1,), (1,)), ((), ())),
            preferred_element_type=jnp.float32)
        o_ref[...] = (acc_ref[...] + b_ref[...] + lora).astype(o_ref.dtype)


def linear_lora_forward(x, w_pre, b_pre, w_a, w_b, *, lora_alpha=16, r=None,
                        tm=256, tn=512, tk=512):
    """x: [..., in_dim];  w_pre: [out, in];  b_pre: [out];  w_a: [r, in];  w_b: [out, r]."""
    if r is None:
        r = w_a.shape[0]
    scaling = float(lora_alpha) / float(r)
    in_dim = x.shape[-1]
    out_dim = w_pre.shape[0]

    lead_shape = x.shape[:-1]
    M = math.prod(lead_shape) if lead_shape else 1
    x2 = x.reshape(M, in_dim)

    # Row tiling: pad M so every grid step gets a full (tm, tk) tile; the pad
    # rows are computed but sliced away before returning.
    sub = 16 if x.dtype == jnp.bfloat16 else 8
    tm = min(tm, _round_up(M, sub))
    m_pad = _round_up(M, tm)
    if m_pad != M:
        x2 = jnp.pad(x2, ((0, m_pad - M), (0, 0)))

    tn = _pick_tile(out_dim, tn)
    tk = _pick_tile(in_dim, tk)

    b2 = b_pre.reshape(1, out_dim)

    grid = (m_pad // tm, out_dim // tn, in_dim // tk)

    # Rough resident-VMEM estimate (double-buffered inputs/outputs + scratch),
    # used to set an explicit scoped-VMEM limit with headroom (cap below v7x's
    # 64 MiB physical VMEM).
    xi = jnp.dtype(x.dtype).itemsize
    wi = jnp.dtype(w_pre.dtype).itemsize
    resident = 2 * (tm * tk * xi + tn * tk * wi + tn * wi + r * tk * wi
                    + tn * r * wi + tm * tn * xi) + 4 * tm * (tn + 128)
    vmem_limit = min(max(int(resident * 2) + (2 << 20), 16 << 20), 48 << 20)

    kernel = functools.partial(_lora_kernel, scaling=scaling)

    out = pl.pallas_call(
        kernel,
        out_shape=jax.ShapeDtypeStruct((m_pad, out_dim), x.dtype),
        grid_spec=pltpu.PrefetchScalarGridSpec(
            num_scalar_prefetch=0,
            grid=grid,
            in_specs=[
                pl.BlockSpec((tm, tk), lambda i, j, k: (i, k)),   # x rows
                pl.BlockSpec((tn, tk), lambda i, j, k: (j, k)),   # W_pre [out,in]
                pl.BlockSpec((1, tn), lambda i, j, k: (0, j)),    # bias
                pl.BlockSpec((r, tk), lambda i, j, k: (0, k)),    # lora_A [r,in]
                pl.BlockSpec((tn, r), lambda i, j, k: (j, 0)),    # lora_B [out,r]
            ],
            out_specs=pl.BlockSpec((tm, tn), lambda i, j, k: (i, j)),
            scratch_shapes=[
                pltpu.VMEM((tm, tn), jnp.float32),  # main accumulator
                pltpu.VMEM((tm, r), jnp.float32),   # LoRA-A activation
            ],
        ),
        compiler_params=pltpu.CompilerParams(
            # The N axis (j) stays 'arbitrary' because the LoRA-A activation
            # computed at j==0 is reused for j>0; the row axis carries the
            # cross-core parallelism (v7x megacore) instead.
            dimension_semantics=("parallel", "arbitrary", "arbitrary"),
            vmem_limit_bytes=vmem_limit,
        ),
    )(x2, w_pre, b2, w_a, w_b)

    if m_pad != M:
        out = out[:M]
    return out.reshape(*lead_shape, out_dim)


def init_params(key, in_dim, out_dim, r):
    """Deterministic init mirroring the PyTorch module's __init__ shapes."""
    k1, k2, k3, _ = jax.random.split(key, 4)
    bound_pre = 1.0 / math.sqrt(in_dim)
    w_pre = jax.random.uniform(k1, (out_dim, in_dim), jnp.float32,
                               -bound_pre, bound_pre)
    b_pre = jax.random.uniform(k2, (out_dim,), jnp.float32,
                               -bound_pre, bound_pre)
    # lora_A: kaiming_uniform_(a=sqrt(5)) -> U(-1/sqrt(fan_in), 1/sqrt(fan_in))
    bound_a = 1.0 / math.sqrt(in_dim)
    w_a = jax.random.uniform(k3, (r, in_dim), jnp.float32, -bound_a, bound_a)
    # lora_B: zeros (module default)
    w_b = jnp.zeros((out_dim, r), jnp.float32)
    return w_pre, b_pre, w_a, w_b


if __name__ == "__main__":
    key = jax.random.PRNGKey(0)
    kx, kp, kb, kx2 = jax.random.split(key, 4)

    r, lora_alpha = 8, 16
    scaling = lora_alpha / r

    # Test 1: module-default init (lora_B == 0), batch=2, seq=8, hidden=32.
    batch, seq, in_dim, out_dim = 2, 8, 32, 32
    x = jax.random.normal(kx, (batch, seq, in_dim), jnp.float32)
    w_pre, b_pre, w_a, w_b = init_params(kp, in_dim, out_dim, r)

    out = linear_lora_forward(x, w_pre, b_pre, w_a, w_b,
                              lora_alpha=lora_alpha, r=r)
    out = jax.block_until_ready(out)
    ref = x @ w_pre.T + b_pre + ((x @ w_a.T) @ w_b.T) * scaling
    assert out.shape == (batch, seq, out_dim)
    assert jnp.allclose(out, ref, atol=1e-4, rtol=1e-4), "mismatch vs reference (test 1)"

    # Test 2: non-zero lora_B, ragged row count (exercises M padding), rectangular dims.
    batch2, seq2, in2, out2 = 2, 7, 32, 48
    x_b = jax.random.normal(kx2, (batch2, seq2, in2), jnp.float32)
    w_pre2, b_pre2, w_a2, _ = init_params(kp, in2, out2, r)
    w_b2 = 0.05 * jax.random.normal(kb, (out2, r), jnp.float32)
    out_b = linear_lora_forward(x_b, w_pre2, b_pre2, w_a2, w_b2,
                                lora_alpha=lora_alpha, r=r)
    out_b = jax.block_until_ready(out_b)
    ref_b = x_b @ w_pre2.T + b_pre2 + ((x_b @ w_a2.T) @ w_b2.T) * scaling
    assert out_b.shape == (batch2, seq2, out2)
    assert jnp.allclose(out_b, ref_b, atol=1e-4, rtol=1e-4), "mismatch vs reference (test 2)"

    print("KERNEL_OK")
</pallas_src>

<mosaic_0001>
module attributes {stable_mosaic.version = 11 : i64} {
  func.func @_lora_kernel(%arg0: i32, %arg1: i32, %arg2: i32, %arg3: memref<16x32xf32, #tpu.memory_space<vmem>>, %arg4: memref<32x32xf32, #tpu.memory_space<vmem>>, %arg5: memref<1x32xf32, #tpu.memory_space<vmem>>, %arg6: memref<8x32xf32, #tpu.memory_space<vmem>>, %arg7: memref<32x8xf32, #tpu.memory_space<vmem>>, %arg8: memref<16x32xf32, #tpu.memory_space<vmem>>, %arg9: memref<16x32xf32, #tpu.memory_space<vmem>>, %arg10: memref<16x8xf32, #tpu.memory_space<vmem>>) attributes {dimension_semantics = [#tpu.dimension_semantics<parallel>, #tpu.dimension_semantics<arbitrary>, #tpu.dimension_semantics<arbitrary>], iteration_bounds = array<i64: 1, 1, 1>, scalar_prefetch = 0 : i64, scratch_operands = 2 : i64, tpu.core_type = #tpu.core_type<tc>, window_params = [{transform_indices = @transform_0, window_bounds = array<i64: 16, 32>}, {transform_indices = @transform_1, window_bounds = array<i64: 32, 32>}, {transform_indices = @transform_2, window_bounds = array<i64: 1, 32>}, {transform_indices = @transform_3, window_bounds = array<i64: 8, 32>}, {transform_indices = @transform_4, window_bounds = array<i64: 32, 8>}, {transform_indices = @transform_5, window_bounds = array<i64: 16, 32>}]} {
    %c0_i32 = arith.constant 0 : i32
    %0 = arith.cmpi eq, %arg2, %c0_i32 : i32
    %1 = arith.extui %0 : i1 to i32
    %c0_i32_0 = arith.constant 0 : i32
    %2 = arith.cmpi ne, %1, %c0_i32_0 : i32
    scf.if %2 {
      %cst_15 = arith.constant 0.000000e+00 : f32
      %20 = vector.broadcast %cst_15 : f32 to vector<16x32xf32>
      %c0_16 = arith.constant 0 : index
      %c0_17 = arith.constant 0 : index
      %21 = vector.load %arg9[%c0_16, %c0_17] : memref<16x32xf32, #tpu.memory_space<vmem>>, vector<16x32xf32>
      tpu.vector_store %arg9[%c0_16, %c0_17], %20 {strides = array<i32>} : memref<16x32xf32, #tpu.memory_space<vmem>>, vector<16x32xf32>,
    } else {
    }
    %c0_i32_1 = arith.constant 0 : i32
    %3 = arith.cmpi eq, %arg1, %c0_i32_1 : i32
    %c0_i32_2 = arith.constant 0 : i32
    %4 = arith.cmpi eq, %arg2, %c0_i32_2 : i32
    %5 = arith.andi %3, %4 : i1
    %6 = arith.extui %5 : i1 to i32
    %c0_i32_3 = arith.constant 0 : i32
    %7 = arith.cmpi ne, %6, %c0_i32_3 : i32
    scf.if %7 {
      %cst_15 = arith.constant 0.000000e+00 : f32
      %20 = vector.broadcast %cst_15 : f32 to vector<16x8xf32>
      %c0_16 = arith.constant 0 : index
      %c0_17 = arith.constant 0 : index
      %21 = vector.load %arg10[%c0_16, %c0_17] : memref<16x8xf32, #tpu.memory_space<vmem>>, vector<16x8xf32>
      tpu.vector_store %arg10[%c0_16, %c0_17], %20 {strides = array<i32>} : memref<16x8xf32, #tpu.memory_space<vmem>>, vector<16x8xf32>,
    } else {
    }
    %c0 = arith.constant 0 : index
    %c0_4 = arith.constant 0 : index
    %8 = vector.load %arg3[%c0, %c0_4] : memref<16x32xf32, #tpu.memory_space<vmem>>, vector<16x32xf32>
    %c0_5 = arith.constant 0 : index
    %c0_6 = arith.constant 0 : index
    %9 = vector.load %arg9[%c0_5, %c0_6] : memref<16x32xf32, #tpu.memory_space<vmem>>, vector<16x32xf32>
    %c0_7 = arith.constant 0 : index
    %c0_8 = arith.constant 0 : index
    %10 = vector.load %arg4[%c0_7, %c0_8] : memref<32x32xf32, #tpu.memory_space<vmem>>, vector<32x32xf32>
    %cst = arith.constant dense<0.000000e+00> : vector<16x32xf32>
    %11 = tpu.matmul %8, %10, %cst {dimension_numbers = #tpu.dot_dimension_numbers<[1], [1], [0], [0], [0, 0, 1, 0], [], []>} : vector<16x32xf32>, vector<32x32xf32>, vector<16x32xf32> -> vector<16x32xf32>
    %12 = arith.addf %9, %11 : vector<16x32xf32>
    %c0_9 = arith.constant 0 : index
    %c0_10 = arith.constant 0 : index
    %13 = vector.load %arg9[%c0_9, %c0_10] : memref<16x32xf32, #tpu.memory_space<vmem>>, vector<16x32xf32>
    tpu.vector_store %arg9[%c0_9, %c0_10], %12 {strides = array<i32>} : memref<16x32xf32, #tpu.memory_space<vmem>>, vector<16x32xf32>,
    %c0_i32_11 = arith.constant 0 : i32
    %14 = arith.cmpi eq, %arg1, %c0_i32_11 : i32
    %15 = arith.extui %14 : i1 to i32
    %c0_i32_12 = arith.constant 0 : i32
    %16 = arith.cmpi ne, %15, %c0_i32_12 : i32
    scf.if %16 {
      %c0_15 = arith.constant 0 : index
      %c0_16 = arith.constant 0 : index
      %20 = vector.load %arg10[%c0_15, %c0_16] : memref<16x8xf32, #tpu.memory_space<vmem>>, vector<16x8xf32>
      %c0_17 = arith.constant 0 : index
      %c0_18 = arith.constant 0 : index
      %21 = vector.load %arg6[%c0_17, %c0_18] : memref<8x32xf32, #tpu.memory_space<vmem>>, vector<8x32xf32>
      %cst_19 = arith.constant dense<0.000000e+00> : vector<16x8xf32>
      %22 = tpu.matmul %8, %21, %cst_19 {dimension_numbers = #tpu.dot_dimension_numbers<[1], [1], [0], [0], [0, 0, 1, 0], [], []>} : vector<16x32xf32>, vector<8x32xf32>, vector<16x8xf32> -> vector<16x8xf32>
      %23 = arith.addf %20, %22 : vector<16x8xf32>
      %c0_20 = arith.constant 0 : index
      %c0_21 = arith.constant 0 : index
      %24 = vector.load %arg10[%c0_20, %c0_21] : memref<16x8xf32, #tpu.memory_space<vmem>>, vector<16x8xf32>
      tpu.vector_store %arg10[%c0_20, %c0_21], %23 {strides = array<i32>} : memref<16x8xf32, #tpu.memory_space<vmem>>, vector<16x8xf32>,
    } else {
    }
    %c0_i32_13 = arith.constant 0 : i32
    %17 = arith.cmpi eq, %arg2, %c0_i32_13 : i32
    %18 = arith.extui %17 : i1 to i32
    %c0_i32_14 = arith.constant 0 : i32
    %19 = arith.cmpi ne, %18, %c0_i32_14 : i32
    scf.if %19 {
      %c0_15 = arith.constant 0 : index
      %c0_16 = arith.constant 0 : index
      %20 = vector.load %arg10[%c0_15, %c0_16] : memref<16x8xf32, #tpu.memory_space<vmem>>, vector<16x8xf32>
      %cst_17 = arith.constant 2.000000e+00 : f32
      %21 = vector.broadcast %cst_17 : f32 to vector<16x8xf32>
      %22 = arith.mulf %20, %21 : vector<16x8xf32>
      %c0_18 = arith.constant 0 : index
      %c0_19 = arith.constant 0 : index
      %23 = vector.load %arg7[%c0_18, %c0_19] : memref<32x8xf32, #tpu.memory_space<vmem>>, vector<32x8xf32>
      %cst_20 = arith.constant dense<0.000000e+00> : vector<16x32xf32>
      %24 = tpu.matmul %22, %23, %cst_20 {dimension_numbers = #tpu.dot_dimension_numbers<[1], [1], [0], [0], [0, 0, 1, 0], [], []>} : vector<16x8xf32>, vector<32x8xf32>, vector<16x32xf32> -> vector<16x32xf32>
      %c0_21 = arith.constant 0 : index
      %c0_22 = arith.constant 0 : index
      %25 = vector.load %arg9[%c0_21, %c0_22] : memref<16x32xf32, #tpu.memory_space<vmem>>, vector<16x32xf32>
      %c0_23 = arith.constant 0 : index
      %c0_24 = arith.constant 0 : index
      %26 = vector.load %arg5[%c0_23, %c0_24] : memref<1x32xf32, #tpu.memory_space<vmem>>, vector<1x32xf32>
      %27 = vector.broadcast %26 : vector<1x32xf32> to vector<16x32xf32>
      %28 = arith.addf %25, %27 : vector<16x32xf32>
      %29 = arith.addf %28, %24 : vector<16x32xf32>
      %c0_25 = arith.constant 0 : index
      %c0_26 = arith.constant 0 : index
      %30 = vector.load %arg8[%c0_25, %c0_26] : memref<16x32xf32, #tpu.memory_space<vmem>>, vector<16x32xf32>
      tpu.vector_store %arg8[%c0_25, %c0_26], %29 {strides = array<i32>} : memref<16x32xf32, #tpu.memory_space<vmem>>, vector<16x32xf32>,
    } else {
    }
    return
  }
  func.func @transform_0(%arg0: i32, %arg1: i32, %arg2: i32) -> (i32, i32) {
    %c0_i32 = arith.constant 0 : i32
    return %arg0, %arg2 : i32, i32
  }
  func.func @transform_1(%arg0: i32, %arg1: i32, %arg2: i32) -> (i32, i32) {
    %c0_i32 = arith.constant 0 : i32
    return %arg1, %arg2 : i32, i32
  }
  func.func @transform_2(%arg0: i32, %arg1: i32, %arg2: i32) -> (i32, i32) {
    %c0_i32 = arith.constant 0 : i32
    %c0_i32_0 = arith.constant 0 : i32
    return %c0_i32, %arg1 : i32, i32
  }
  func.func @transform_3(%arg0: i32, %arg1: i32, %arg2: i32) -> (i32, i32) {
    %c0_i32 = arith.constant 0 : i32
    %c0_i32_0 = arith.constant 0 : i32
    return %c0_i32, %arg2 : i32, i32
  }
  func.func @transform_4(%arg0: i32, %arg1: i32, %arg2: i32) -> (i32, i32) {
    %c0_i32 = arith.constant 0 : i32
    %c0_i32_0 = arith.constant 0 : i32
    return %arg1, %c0_i32 : i32, i32
  }
  func.func @transform_5(%arg0: i32, %arg1: i32, %arg2: i32) -> (i32, i32) {
    %c0_i32 = arith.constant 0 : i32
    return %arg0, %arg1 : i32, i32
  }
}

</mosaic_0001>

<bundles_post_ra>
// kernel: tpu_custom_call.1
= control target key start
LH: loop header
LB: loop body
LE: loop exit
PB: predicated region body
PF: predicated region fallthrough
CT: control target
= control target key end

     0   :  { %10 = vsyncpa [#allocation5], 0  ;;  %s418_s0 = inlined_call_operand.hbm [shape: f32[16,32], index: 0, kind: input, shape index: {}]   ;;  %s419_s1 = inlined_call_operand.vmem [shape: f32[32,32], index: 1, kind: input, shape index: {}]   ;;  %s420_s2 = inlined_call_operand.vmem [shape: f32[1,32], index: 2, kind: input, shape index: {}]   ;;  %s421_s3 = inlined_call_operand.vmem [shape: f32[8,32], index: 3, kind: input, shape index: {}]   ;;  %s422_s4 = inlined_call_operand.vmem [shape: f32[32,8], index: 4, kind: input, shape index: {}]   ;;  %s423_s5 = inlined_call_operand.hbm [shape: f32[16,32], index: 5, kind: output, shape index: {}]  }
   0x1   :  { %11 = vsyncpa [#allocation6], 0  ;;  %s16_s20 = sshll.u32 %s418_s0, 4  ;;  %s308_s21 = smov [#allocation4]   ;;  %s17_s20 = int_to_ptr.hbm [resolvable:$true] %s16_s20 }
   0x2   :  { %s18_s22 = sshll.u32 %s308_s21, 4  ;;  %s309_s23 = smov 128   ;;  %s19_s22 = int_to_ptr.vmem [resolvable:$true] %s18_s22 }
   0x3   :  { %s310_s24 = smov 8  }
   0x4   :  { %24 = dma.hbm_to_vmem [thread:$0]  %s17_s20, 256, %s19_s22, [#allocation5], %s309_s23, %s309_s23, %s310_s24  }
   0x5   :  { %304 = dma.done.wait [#allocation5], 256  }
   0x6   :  { %305 = vsyncadd [#allocation5], 4294967040  ;;  %vm49_vm0 = vcmask 64512   ;;  %vm41_vm1 = vcmask 261120   ;;  %v311_v0 = vmov 0.0   ;;  %v111_v1 = vld [vmem:[%s421_s3] sm:$0xff] }
   0x7   :  { %50 = vst.msk [vmem:[#allocation3] sm:$0xff] %vm49_vm0, %v311_v0  ;;  %233 = vmatpush.xpose.msk.msra.mxu1 %vm41_vm1, %v111_v1  ;;  %v52_v2 = vld [vmem:[#allocation4] sm:$0xff]  ;;  %v59_v3 = vld [vmem:[%s419_s1 + $0x18] sm:$0xff]  ;;  %v58_v5 = vld [vmem:[%s419_s1 + $0x10] sm:$0xff]  ;;  %s312_s16 = smov [#allocation7]   ;;  %s214_s20 = sshll.u32 %s423_s5, 4  ;;  %s215_s20 = int_to_ptr.hbm [resolvable:$true] %s214_s20 }
   0x8   :  { %42 = vst.msk [vmem:[#allocation2] sm:$0xff] %vm41_vm1, %v311_v0  ;;  %227 = vmatpush.xpose.msk.msra.mxu0 %vm41_vm1, %v59_v3  ;;  %242 = vmatpush.xpose.msk.msra.mxu3 %vm41_vm1, %v59_v3  ;;  %v153_v4 = vld [vmem:[%s422_s4 + $0x18] sm:$0xff]  ;;  %v57_v6 = vld [vmem:[%s419_s1 + $0x8] sm:$0xff]  ;;  %v56_v8 = vld [vmem:[%s419_s1] sm:$0xff]  ;;  %s212_s17 = sshll.u32 %s312_s16, 4  ;;  %s213_s17 = int_to_ptr.vmem [resolvable:$true] %s212_s17 }
   0x9   :  { %43 = vst.msk [vmem:[#allocation2 + $0x8] sm:$0xff] %vm41_vm1, %v311_v0  ;;  %246 = vmatpush.xpose.msk.msra.mxu2 %vm49_vm0, %v153_v4  ;;  %v53_v7 = vld [vmem:[#allocation4 + $0x8] sm:$0xff]  ;;  %v152_v9 = vld [vmem:[%s422_s4 + $0x10] sm:$0xff]  ;;  %v150_v11 = vld [vmem:[%s422_s4] sm:$0xff] }
   0xa   :  { %51 = vst.msk [vmem:[#allocation3 + $0x8] sm:$0xff] %vm49_vm0, %v311_v0  ;;  %234 = vmatmul.msk.f32.vlgmr.msra.gmra.mxu1 %vm41_vm1, %v52_v2  ;;  %v151_v10 = vld [vmem:[%s422_s4 + $0x8] sm:$0xff]  ;;  %v255_v28 = vld [vmem:[%s420_s2] ss:$0 sm:$0xff] }
   0xb   :  { %236 = vmatpush.xpose.msk.msrb.mxu1 %vm49_vm0, %v153_v4 }
   0xc   :  { %228 = vmatpush.xpose.msk.msra.mxu0 %vm41_vm1, %v58_v5  ;;  %243 = vmatpush.xpose.msk.msra.mxu3 %vm41_vm1, %v58_v5 }
   0xd   :  { %247 = vmatpush.xpose.msk.msra.mxu2 %vm49_vm0, %v152_v9 }
   0xe   :  { %v109_v12 = vld [vmem:[#allocation3] sm:$0xff] }
   0xf   :  { %237 = vmatpush.xpose.msk.msrb.mxu1 %vm49_vm0, %v152_v9  ;;  %v54_v20 = vld [vmem:[#allocation2] sm:$0xff] }
  0x10   :  { %229 = vmatpush.xpose.msk.msra.mxu0 %vm41_vm1, %v57_v6  ;;  %244 = vmatpush.xpose.msk.msra.mxu3 %vm41_vm1, %v57_v6  ;;  %v55_v25 = vld [vmem:[#allocation2 + $0x8] sm:$0xff] }
  0x11   :  { %248 = vmatpush.xpose.msk.msra.mxu2 %vm49_vm0, %v151_v10  ;;  %v110_v15 = vld [vmem:[#allocation3 + $0x8] sm:$0xff] }
  0x12   :  { %235 = vmatmul.msk.f32.gmra.mxu1 %vm41_vm1, %v53_v7 }
  0x13   :  { %238 = vmatpush.xpose.msk.msrb.mxu1 %vm49_vm0, %v151_v10 }
  0x14   :  { %230 = vmatpush.xpose.msk.msra.mxu0 %vm41_vm1, %v56_v8  ;;  %245 = vmatpush.xpose.msk.msra.mxu3 %vm41_vm1, %v56_v8 }
  0x15   :  { %249 = vmatpush.xpose.msk.msra.mxu2 %vm49_vm0, %v150_v11 }
  0x17   :  { %231 = vmatmul.msk.f32.vlgmr.msra.gmra.mxu0 %vm41_vm1, %v52_v2  ;;  %232 = vmatmul.msk.f32.vlgmr.msra.gmra.mxu3 %vm41_vm1, %v53_v7 }
  0x18   :  { %239 = vmatpush.xpose.msk.msrb.mxu1 %vm49_vm0, %v150_v11 }
  0x87   :  { %v132_v13 = vpop.f32.mrf.mxu1 }
  0x88   :  { %v138_v14 = vadd.f32 %v132_v13, %v109_v12 }
  0x8a   :  { %141 = vst.msk [vmem:[#allocation3] sm:$0xff] %vm49_vm0, %v138_v14 }
  0x8f   :  { %v135_v16 = vpop.f32.mrf.mxu1 }
  0x90   :  { %v139_v17 = vadd.f32 %v135_v16, %v110_v15 }
  0x91   :  { %v146_v18 = vld [vmem:[#allocation3] sm:$0xff] }
  0x92   :  { %142 = vst.msk [vmem:[#allocation3 + $0x8] sm:$0xff] %vm49_vm0, %v139_v17  ;;  %v148_v19 = vmul.f32 2.0, %v146_v18 }
  0x94   :  { %240 = vmatmul.msk.f32.vlgmr.msrb.gmra.mxu1 %vm49_vm0, %v148_v19  ;;  %v96_v21 = vpop.f32.mrf.mxu0 }
  0x95   :  { %v102_v22 = vadd.f32 %v96_v21, %v54_v20 }
  0x97   :  { %104 = vst.msk [vmem:[#allocation2] sm:$0xff] %vm41_vm1, %v102_v22 }
  0x99   :  { %v147_v23 = vld [vmem:[#allocation3 + $0x8] sm:$0xff] }
  0x9a   :  { %v149_v24 = vmul.f32 2.0, %v147_v23  ;;  %v99_v26 = vpop.f32.mrf.mxu3 }
  0x9b   :  { %v103_v27 = vadd.f32 %v99_v26, %v55_v25 }
  0x9c   :  { %241 = vmatmul.msk.f32.vlgmr.msra.gmra.mxu2 %vm49_vm0, %v149_v24 }
  0x9d   :  { %105 = vst.msk [vmem:[#allocation2 + $0x8] sm:$0xff] %vm41_vm1, %v103_v27 }
  0x9e   :  { %v196_v29 = vld [vmem:[#allocation2] sm:$0xff] }
  0x9f   :  { %v202_v30 = vadd.f32 %v255_v28, %v196_v29 }
  0xa4   :  { %v197_v33 = vld [vmem:[#allocation2 + $0x8] sm:$0xff] }
  0xa5   :  { %v203_v34 = vadd.f32 %v255_v28, %v197_v33 }
 0x111   :  { %v190_v31 = vpop.f32.mrf.mxu1 }
 0x112   :  { %v204_v32 = vadd.f32 %v202_v30, %v190_v31 }
 0x114   :  { %206 = vst.msk [vmem:[#allocation7] sm:$0xff] %vm41_vm1, %v204_v32 }
 0x11f   :  { %v193_v35 = vpop.f32.mrf.mxu2 }
 0x120   :  { %v205_v36 = vadd.f32 %v203_v34, %v193_v35 }
 0x122   :  { %207 = vst.msk [vmem:[#allocation7 + $0x8] sm:$0xff] %vm41_vm1, %v205_v36 }
 0x123   :  { %220 = dma.vmem_to_hbm [thread:$0]  %s213_s17, 256, %s215_s20, [#allocation6], %s309_s23, %s309_s23, %s310_s24  }
 0x124   :  { %306 = dma.done.wait [#allocation6], 256  }
 0x125   :  { %307 = vsyncadd [#allocation6], 4294967040 }
 0x126   :  { %225 = vsyncpa [#allocation5], 1 }
 0x127   :  { %226 = vsyncpa [#allocation6], 1 }

</bundles_post_ra>
